<compile_context>
chip_gen: v6e
topology: v6e:2x2x1
jax: 0.10.0
libtpu: 0.0.40
codegen_flags: <defaults>
</compile_context>

<pallas_src>
import functools

import jax
import jax.numpy as jnp
import numpy as np
from jax.experimental import pallas as pl
from jax.experimental.pallas import tpu as pltpu


def _resblock_kernel(xph_ref, w1_ref, w2_ref, rd_ref,
                     g1_ref, b1_ref, g2_ref, b2_ref,
                     o_ref, *hpad_refs,
                     K, stride, pad, lout1, lout2, eps, compute_dtype, has_down):
    """Fused ResBlock forward.

    In-kernel layout is (channels, length) per batch element: the length axis sits on
    lanes, each conv tap is a plain 2-D MXU matmul contracting over the input channels
    only, and the BatchNorm reductions are lane (axis=-1) reductions.  The batch
    dimension is unrolled in Python (tiny N); BN batch statistics are accumulated
    across all unrolled batch elements, matching nn.BatchNorm1d training semantics.
    """
    s = stride
    n_batch = o_ref.shape[0]
    cout = o_ref.shape[1]

    # Read each polyphase slab of x exactly once (total == one copy of x).
    phases = [xph_ref[p] for p in range(s)]          # each (N, Cin, Lph)
    w1 = [w1_ref[k] for k in range(K)]               # per-tap (Cout, Cin)
    w2 = [w2_ref[k] for k in range(K)]               # per-tap (Cout, Cout)
    wd = [rd_ref[k] for k in range(K)] if has_down else None

    # ---- conv1 (+ downsample conv): K unrolled taps, Cin-only MXU contraction ----
    y1, res = [], []
    for b in range(n_batch):
        acc = jnp.zeros((cout, lout1), jnp.float32)
        accd = jnp.zeros((cout, lout1), jnp.float32) if has_down else None
        for k in range(K):
            p, q = k % s, k // s
            xk = phases[p][b, :, q:q + lout1]                          # (Cin, Lout1)
            acc = acc + jnp.dot(w1[k], xk, preferred_element_type=jnp.float32)
            if has_down:
                accd = accd + jnp.dot(wd[k], xk, preferred_element_type=jnp.float32)
        y1.append(acc)
        res.append(accd if has_down else rd_ref[b].astype(jnp.float32))

    # ---- train-mode BatchNorm folded into one scale/shift FMA (f32) ----
    def bn_scale_shift(ys, gamma, beta):
        cnt = float(n_batch * ys[0].shape[-1])
        ssum = sum(jnp.sum(y, axis=-1, keepdims=True) for y in ys)     # (Cout, 1)
        ssq = sum(jnp.sum(y * y, axis=-1, keepdims=True) for y in ys)  # one pass
        mean = ssum / cnt
        var = ssq / cnt - mean * mean
        scale = gamma * jax.lax.rsqrt(var + eps)
        shift = beta - mean * scale
        return scale, shift

    sc1, sh1 = bn_scale_shift(y1, g1_ref[...], b1_ref[...])

    # h = relu(bn1(conv1(x))) stays in VMEM scratch (zero-padded along L):
    # the intermediate never round-trips through HBM.
    for b in range(n_batch):
        hb = hpad_refs[b]
        hb[...] = jnp.zeros_like(hb)
        hb[:, pad:pad + lout1] = jnp.maximum(y1[b] * sc1 + sh1, 0.0).astype(compute_dtype)

    # ---- conv2 (stride 1) straight out of VMEM ----
    y2 = []
    for b in range(n_batch):
        acc = jnp.zeros((cout, lout2), jnp.float32)
        for k in range(K):
            hk = hpad_refs[b][:, k:k + lout2]                          # (Cout, Lout2)
            acc = acc + jnp.dot(w2[k], hk, preferred_element_type=jnp.float32)
        y2.append(acc)

    sc2, sh2 = bn_scale_shift(y2, g2_ref[...], b2_ref[...])

    # PyTorch order: ReLU BEFORE the residual add; the downsample branch has no BN.
    for b in range(n_batch):
        o_ref[b] = (jnp.maximum(y2[b] * sc2 + sh2, 0.0) + res[b]).astype(o_ref.dtype)


def resblock_forward(x_ncl, params, *, kernel_size, stride,
                     compute_dtype=jnp.float32, eps=1e-5):
    """ResBlock forward in one pallas_call.  x_ncl: (N, Cin, L) -> (N, Cout, Lout)."""
    n, cin, l = x_ncl.shape
    w1, w2, wd = params["w1"], params["w2"], params["w_down"]
    cout, _, k = w1.shape
    assert k == kernel_size
    pad = k // 2
    s = int(stride)
    lout1 = (l + 2 * pad - k) // s + 1
    lout2 = lout1 + 2 * pad - k + 1
    has_down = wd is not None

    # Polyphase split of the padded input: every stride-s conv tap becomes a
    # contiguous slice in-kernel.  Total bytes ~= one copy of x (no im2col blowup).
    xpad = jnp.pad(x_ncl, ((0, 0), (0, 0), (pad, pad)))
    lpad = l + 2 * pad
    lph = -(-lpad // s)
    xpad = jnp.pad(xpad, ((0, 0), (0, 0), (0, lph * s - lpad)))
    xph = jnp.stack([xpad[:, :, p::s] for p in range(s)], axis=0)      # (s,N,Cin,Lph)
    xph = xph.astype(compute_dtype)

    # Per-tap weight matrices (K, Cout, Cin): each tap contracts over Cin only.
    w1_t = jnp.transpose(w1, (2, 0, 1)).astype(compute_dtype)
    w2_t = jnp.transpose(w2, (2, 0, 1)).astype(compute_dtype)
    if has_down:
        rd_in = jnp.transpose(wd, (2, 0, 1)).astype(compute_dtype)     # downsample taps
    else:
        assert cin == cout and lout2 == l, "identity residual needs matching shapes"
        rd_in = x_ncl.astype(jnp.float32)        # identity residual (no dummy zeros DMA)

    g1 = params["gamma1"].reshape(cout, 1).astype(jnp.float32)
    b1 = params["beta1"].reshape(cout, 1).astype(jnp.float32)
    g2 = params["gamma2"].reshape(cout, 1).astype(jnp.float32)
    b2 = params["beta2"].reshape(cout, 1).astype(jnp.float32)

    inputs = (xph, w1_t, w2_t, rd_in, g1, b1, g2, b2)

    def full_spec(a):
        nd = a.ndim
        return pl.BlockSpec(a.shape, lambda i, _nd=nd: (0,) * _nd)

    kernel = functools.partial(
        _resblock_kernel, K=k, stride=s, pad=pad, lout1=lout1, lout2=lout2,
        eps=eps, compute_dtype=compute_dtype, has_down=has_down)

    # TODO(synk): for large N*L this needs a row-tiled grid plus a two-pass BatchNorm
    # (accumulate sum/sumsq across an "arbitrary" grid axis, then normalize); at these
    # shapes the whole batch fits in VMEM so one fused step keeps BN stats exact and
    # keeps h / residual resident on-chip.
    out = pl.pallas_call(
        kernel,
        out_shape=jax.ShapeDtypeStruct((n, cout, lout2), jnp.float32),
        grid_spec=pltpu.PrefetchScalarGridSpec(
            num_scalar_prefetch=0,
            grid=(1,),
            in_specs=[full_spec(a) for a in inputs],
            out_specs=pl.BlockSpec((n, cout, lout2), lambda i: (0, 0, 0)),
            scratch_shapes=[pltpu.VMEM((cout, lout1 + 2 * pad), compute_dtype)
                            for _ in range(n)]),
        compiler_params=pltpu.CompilerParams(dimension_semantics=("arbitrary",)),
    )(*inputs)
    return out  # already (N, Cout, Lout) == NCL


# ----------------------- pure-JAX reference (for checking) -----------------------
def _conv1d_ref(x_ncl, w, stride, pad):
    return jax.lax.conv_general_dilated(
        x_ncl, w, window_strides=(stride,), padding=[(pad, pad)],
        dimension_numbers=("NCH", "OIH", "NCH"))


def _bn_train_ref(y_ncl, gamma, beta, eps=1e-5):
    mean = jnp.mean(y_ncl, axis=(0, 2), keepdims=True)
    var = jnp.mean(jnp.square(y_ncl - mean), axis=(0, 2), keepdims=True)
    yhat = (y_ncl - mean) / jnp.sqrt(var + eps)
    return yhat * gamma[None, :, None] + beta[None, :, None]


def resblock_ref(x, params, kernel_size, stride):
    pad = kernel_size // 2
    res = x if params["w_down"] is None else _conv1d_ref(x, params["w_down"], stride, pad)
    h = jnp.maximum(_bn_train_ref(_conv1d_ref(x, params["w1"], stride, pad),
                                  params["gamma1"], params["beta1"]), 0.0)
    h = jnp.maximum(_bn_train_ref(_conv1d_ref(h, params["w2"], 1, pad),
                                  params["gamma2"], params["beta2"]), 0.0)
    return h + res


if __name__ == "__main__":
    # Config 1: inchannel != outchannel -> downsample conv active, stride 2.
    N, Cin, Cout, L, K, STRIDE = 2, 4, 8, 16, 3, 2
    key = jax.random.PRNGKey(0)
    k1, k2, k3, k4, k5, k6 = jax.random.split(key, 6)
    x = jax.random.normal(k1, (N, Cin, L), jnp.float32)
    params = dict(
        w1=0.3 * jax.random.normal(k2, (Cout, Cin, K), jnp.float32),
        w2=0.3 * jax.random.normal(k3, (Cout, Cout, K), jnp.float32),
        w_down=0.3 * jax.random.normal(k4, (Cout, Cin, K), jnp.float32),
        gamma1=1.0 + 0.1 * jax.random.normal(k5, (Cout,), jnp.float32),
        beta1=0.1 * jax.random.normal(k6, (Cout,), jnp.float32),
        gamma2=jnp.linspace(0.8, 1.2, Cout, dtype=jnp.float32),
        beta2=jnp.linspace(-0.1, 0.1, Cout, dtype=jnp.float32),
    )
    lout = (L + 2 * (K // 2) - K) // STRIDE + 1
    ref = resblock_ref(x, params, K, STRIDE)

    # f32 path: tight check against the reference.
    out = jax.block_until_ready(
        resblock_forward(x, params, kernel_size=K, stride=STRIDE))
    assert out.shape == ref.shape == (N, Cout, lout)
    np.testing.assert_allclose(np.asarray(out), np.asarray(ref), rtol=1e-4, atol=1e-4)

    # bf16 MXU operand path (v6e/v7x): f32 accumulate + f32 BN/ReLU, loose tolerance.
    out_bf16 = jax.block_until_ready(
        resblock_forward(x, params, kernel_size=K, stride=STRIDE,
                         compute_dtype=jnp.bfloat16))
    np.testing.assert_allclose(np.asarray(out_bf16), np.asarray(ref),
                               rtol=2.5e-1, atol=2.5e-1)

    # Config 2: inchannel == outchannel -> identity residual, stride 1.
    C2, L2 = 8, 16
    j1, j2, j3, j4, j5 = jax.random.split(jax.random.PRNGKey(1), 5)
    x2 = jax.random.normal(j1, (N, C2, L2), jnp.float32)
    params2 = dict(
        w1=0.3 * jax.random.normal(j2, (C2, C2, K), jnp.float32),
        w2=0.3 * jax.random.normal(j3, (C2, C2, K), jnp.float32),
        w_down=None,
        gamma1=1.0 + 0.1 * jax.random.normal(j4, (C2,), jnp.float32),
        beta1=0.1 * jax.random.normal(j5, (C2,), jnp.float32),
        gamma2=jnp.linspace(0.9, 1.1, C2, dtype=jnp.float32),
        beta2=jnp.linspace(-0.05, 0.05, C2, dtype=jnp.float32),
    )
    out2 = jax.block_until_ready(
        resblock_forward(x2, params2, kernel_size=K, stride=1))
    ref2 = resblock_ref(x2, params2, K, 1)
    np.testing.assert_allclose(np.asarray(out2), np.asarray(ref2), rtol=1e-4, atol=1e-4)

    print("KERNEL_OK")
</pallas_src>

<mosaic_0001>
module attributes {stable_mosaic.version = 11 : i64} {
  func.func @_resblock_kernel(%arg0: i32, %arg1: memref<2x2x4x9xf32, #tpu.memory_space<vmem>>, %arg2: memref<3x8x4xf32, #tpu.memory_space<vmem>>, %arg3: memref<3x8x8xf32, #tpu.memory_space<vmem>>, %arg4: memref<3x8x4xf32, #tpu.memory_space<vmem>>, %arg5: memref<8x1xf32, #tpu.memory_space<vmem>>, %arg6: memref<8x1xf32, #tpu.memory_space<vmem>>, %arg7: memref<8x1xf32, #tpu.memory_space<vmem>>, %arg8: memref<8x1xf32, #tpu.memory_space<vmem>>, %arg9: memref<2x8x8xf32, #tpu.memory_space<vmem>>, %arg10: memref<8x10xf32, #tpu.memory_space<vmem>>, %arg11: memref<8x10xf32, #tpu.memory_space<vmem>>) attributes {dimension_semantics = [#tpu.dimension_semantics<arbitrary>], iteration_bounds = array<i64: 1>, scalar_prefetch = 0 : i64, scratch_operands = 2 : i64, tpu.core_type = #tpu.core_type<tc>, window_params = [{pipeline_mode = #tpu.pipeline_mode<synchronous>, transform_indices = @transform_0, window_bounds = array<i64: 2, 2, 4, 9>}, {pipeline_mode = #tpu.pipeline_mode<synchronous>, transform_indices = @transform_1, window_bounds = array<i64: 3, 8, 4>}, {pipeline_mode = #tpu.pipeline_mode<synchronous>, transform_indices = @transform_2, window_bounds = array<i64: 3, 8, 8>}, {pipeline_mode = #tpu.pipeline_mode<synchronous>, transform_indices = @transform_3, window_bounds = array<i64: 3, 8, 4>}, {pipeline_mode = #tpu.pipeline_mode<synchronous>, transform_indices = @transform_4, window_bounds = array<i64: 8, 1>}, {pipeline_mode = #tpu.pipeline_mode<synchronous>, transform_indices = @transform_5, window_bounds = array<i64: 8, 1>}, {pipeline_mode = #tpu.pipeline_mode<synchronous>, transform_indices = @transform_6, window_bounds = array<i64: 8, 1>}, {pipeline_mode = #tpu.pipeline_mode<synchronous>, transform_indices = @transform_7, window_bounds = array<i64: 8, 1>}, {pipeline_mode = #tpu.pipeline_mode<synchronous>, transform_indices = @transform_8, window_bounds = array<i64: 2, 8, 8>}]} {
    %c0 = arith.constant 0 : index
    %c0_0 = arith.constant 0 : index
    %c0_1 = arith.constant 0 : index
    %c0_2 = arith.constant 0 : index
    %0 = vector.load %arg1[%c0, %c0_0, %c0_1, %c0_2] : memref<2x2x4x9xf32, #tpu.memory_space<vmem>>, vector<1x2x4x9xf32>
    %1 = vector.shape_cast %0 : vector<1x2x4x9xf32> to vector<2x4x9xf32>
    %c1 = arith.constant 1 : index
    %c0_3 = arith.constant 0 : index
    %c0_4 = arith.constant 0 : index
    %c0_5 = arith.constant 0 : index
    %2 = vector.load %arg1[%c1, %c0_3, %c0_4, %c0_5] : memref<2x2x4x9xf32, #tpu.memory_space<vmem>>, vector<1x2x4x9xf32>
    %3 = vector.shape_cast %2 : vector<1x2x4x9xf32> to vector<2x4x9xf32>
    %c0_6 = arith.constant 0 : index
    %c0_7 = arith.constant 0 : index
    %c0_8 = arith.constant 0 : index
    %4 = vector.load %arg2[%c0_6, %c0_7, %c0_8] : memref<3x8x4xf32, #tpu.memory_space<vmem>>, vector<1x8x4xf32>
    %5 = vector.shape_cast %4 : vector<1x8x4xf32> to vector<8x4xf32>
    %c1_9 = arith.constant 1 : index
    %c0_10 = arith.constant 0 : index
    %c0_11 = arith.constant 0 : index
    %6 = vector.load %arg2[%c1_9, %c0_10, %c0_11] : memref<3x8x4xf32, #tpu.memory_space<vmem>>, vector<1x8x4xf32>
    %7 = vector.shape_cast %6 : vector<1x8x4xf32> to vector<8x4xf32>
    %c2 = arith.constant 2 : index
    %c0_12 = arith.constant 0 : index
    %c0_13 = arith.constant 0 : index
    %8 = vector.load %arg2[%c2, %c0_12, %c0_13] : memref<3x8x4xf32, #tpu.memory_space<vmem>>, vector<1x8x4xf32>
    %9 = vector.shape_cast %8 : vector<1x8x4xf32> to vector<8x4xf32>
    %c0_14 = arith.constant 0 : index
    %c0_15 = arith.constant 0 : index
    %c0_16 = arith.constant 0 : index
    %10 = vector.load %arg3[%c0_14, %c0_15, %c0_16] : memref<3x8x8xf32, #tpu.memory_space<vmem>>, vector<1x8x8xf32>
    %11 = vector.shape_cast %10 : vector<1x8x8xf32> to vector<8x8xf32>
    %c1_17 = arith.constant 1 : index
    %c0_18 = arith.constant 0 : index
    %c0_19 = arith.constant 0 : index
    %12 = vector.load %arg3[%c1_17, %c0_18, %c0_19] : memref<3x8x8xf32, #tpu.memory_space<vmem>>, vector<1x8x8xf32>
    %13 = vector.shape_cast %12 : vector<1x8x8xf32> to vector<8x8xf32>
    %c2_20 = arith.constant 2 : index
    %c0_21 = arith.constant 0 : index
    %c0_22 = arith.constant 0 : index
    %14 = vector.load %arg3[%c2_20, %c0_21, %c0_22] : memref<3x8x8xf32, #tpu.memory_space<vmem>>, vector<1x8x8xf32>
    %15 = vector.shape_cast %14 : vector<1x8x8xf32> to vector<8x8xf32>
    %c0_23 = arith.constant 0 : index
    %c0_24 = arith.constant 0 : index
    %c0_25 = arith.constant 0 : index
    %16 = vector.load %arg4[%c0_23, %c0_24, %c0_25] : memref<3x8x4xf32, #tpu.memory_space<vmem>>, vector<1x8x4xf32>
    %17 = vector.shape_cast %16 : vector<1x8x4xf32> to vector<8x4xf32>
    %c1_26 = arith.constant 1 : index
    %c0_27 = arith.constant 0 : index
    %c0_28 = arith.constant 0 : index
    %18 = vector.load %arg4[%c1_26, %c0_27, %c0_28] : memref<3x8x4xf32, #tpu.memory_space<vmem>>, vector<1x8x4xf32>
    %19 = vector.shape_cast %18 : vector<1x8x4xf32> to vector<8x4xf32>
    %c2_29 = arith.constant 2 : index
    %c0_30 = arith.constant 0 : index
    %c0_31 = arith.constant 0 : index
    %20 = vector.load %arg4[%c2_29, %c0_30, %c0_31] : memref<3x8x4xf32, #tpu.memory_space<vmem>>, vector<1x8x4xf32>
    %21 = vector.shape_cast %20 : vector<1x8x4xf32> to vector<8x4xf32>
    %cst = arith.constant 0.000000e+00 : f32
    %22 = vector.broadcast %cst : f32 to vector<8x8xf32>
    %cst_32 = arith.constant 0.000000e+00 : f32
    %23 = vector.broadcast %cst_32 : f32 to vector<8x8xf32>
    %24 = vector.extract_strided_slice %1 {offsets = [0, 0, 0], sizes = [1, 4, 8], strides = [1, 1, 1]} : vector<2x4x9xf32> to vector<1x4x8xf32>
    %25 = vector.shape_cast %24 : vector<1x4x8xf32> to vector<4x8xf32>
    %cst_33 = arith.constant dense<0.000000e+00> : vector<8x8xf32>
    %26 = tpu.matmul %5, %25, %cst_33 {dimension_numbers = #tpu.dot_dimension_numbers<[1], [0], [0], [1], [0, 0, 1, 1], [], []>} : vector<8x4xf32>, vector<4x8xf32>, vector<8x8xf32> -> vector<8x8xf32>
    %27 = arith.addf %22, %26 : vector<8x8xf32>
    %cst_34 = arith.constant dense<0.000000e+00> : vector<8x8xf32>
    %28 = tpu.matmul %17, %25, %cst_34 {dimension_numbers = #tpu.dot_dimension_numbers<[1], [0], [0], [1], [0, 0, 1, 1], [], []>} : vector<8x4xf32>, vector<4x8xf32>, vector<8x8xf32> -> vector<8x8xf32>
    %29 = arith.addf %23, %28 : vector<8x8xf32>
    %30 = vector.extract_strided_slice %3 {offsets = [0, 0, 0], sizes = [1, 4, 8], strides = [1, 1, 1]} : vector<2x4x9xf32> to vector<1x4x8xf32>
    %31 = vector.shape_cast %30 : vector<1x4x8xf32> to vector<4x8xf32>
    %cst_35 = arith.constant dense<0.000000e+00> : vector<8x8xf32>
    %32 = tpu.matmul %7, %31, %cst_35 {dimension_numbers = #tpu.dot_dimension_numbers<[1], [0], [0], [1], [0, 0, 1, 1], [], []>} : vector<8x4xf32>, vector<4x8xf32>, vector<8x8xf32> -> vector<8x8xf32>
    %33 = arith.addf %27, %32 : vector<8x8xf32>
    %cst_36 = arith.constant dense<0.000000e+00> : vector<8x8xf32>
    %34 = tpu.matmul %19, %31, %cst_36 {dimension_numbers = #tpu.dot_dimension_numbers<[1], [0], [0], [1], [0, 0, 1, 1], [], []>} : vector<8x4xf32>, vector<4x8xf32>, vector<8x8xf32> -> vector<8x8xf32>
    %35 = arith.addf %29, %34 : vector<8x8xf32>
    %36 = vector.extract_strided_slice %1 {offsets = [0, 0, 1], sizes = [1, 4, 8], strides = [1, 1, 1]} : vector<2x4x9xf32> to vector<1x4x8xf32>
    %37 = vector.shape_cast %36 : vector<1x4x8xf32> to vector<4x8xf32>
    %cst_37 = arith.constant dense<0.000000e+00> : vector<8x8xf32>
    %38 = tpu.matmul %9, %37, %cst_37 {dimension_numbers = #tpu.dot_dimension_numbers<[1], [0], [0], [1], [0, 0, 1, 1], [], []>} : vector<8x4xf32>, vector<4x8xf32>, vector<8x8xf32> -> vector<8x8xf32>
    %39 = arith.addf %33, %38 : vector<8x8xf32>
    %cst_38 = arith.constant dense<0.000000e+00> : vector<8x8xf32>
    %40 = tpu.matmul %21, %37, %cst_38 {dimension_numbers = #tpu.dot_dimension_numbers<[1], [0], [0], [1], [0, 0, 1, 1], [], []>} : vector<8x4xf32>, vector<4x8xf32>, vector<8x8xf32> -> vector<8x8xf32>
    %41 = arith.addf %35, %40 : vector<8x8xf32>
    %cst_39 = arith.constant 0.000000e+00 : f32
    %42 = vector.broadcast %cst_39 : f32 to vector<8x8xf32>
    %cst_40 = arith.constant 0.000000e+00 : f32
    %43 = vector.broadcast %cst_40 : f32 to vector<8x8xf32>
    %44 = vector.extract_strided_slice %1 {offsets = [1, 0, 0], sizes = [1, 4, 8], strides = [1, 1, 1]} : vector<2x4x9xf32> to vector<1x4x8xf32>
    %45 = vector.shape_cast %44 : vector<1x4x8xf32> to vector<4x8xf32>
    %cst_41 = arith.constant dense<0.000000e+00> : vector<8x8xf32>
    %46 = tpu.matmul %5, %45, %cst_41 {dimension_numbers = #tpu.dot_dimension_numbers<[1], [0], [0], [1], [0, 0, 1, 1], [], []>} : vector<8x4xf32>, vector<4x8xf32>, vector<8x8xf32> -> vector<8x8xf32>
    %47 = arith.addf %42, %46 : vector<8x8xf32>
    %cst_42 = arith.constant dense<0.000000e+00> : vector<8x8xf32>
    %48 = tpu.matmul %17, %45, %cst_42 {dimension_numbers = #tpu.dot_dimension_numbers<[1], [0], [0], [1], [0, 0, 1, 1], [], []>} : vector<8x4xf32>, vector<4x8xf32>, vector<8x8xf32> -> vector<8x8xf32>
    %49 = arith.addf %43, %48 : vector<8x8xf32>
    %50 = vector.extract_strided_slice %3 {offsets = [1, 0, 0], sizes = [1, 4, 8], strides = [1, 1, 1]} : vector<2x4x9xf32> to vector<1x4x8xf32>
    %51 = vector.shape_cast %50 : vector<1x4x8xf32> to vector<4x8xf32>
    %cst_43 = arith.constant dense<0.000000e+00> : vector<8x8xf32>
    %52 = tpu.matmul %7, %51, %cst_43 {dimension_numbers = #tpu.dot_dimension_numbers<[1], [0], [0], [1], [0, 0, 1, 1], [], []>} : vector<8x4xf32>, vector<4x8xf32>, vector<8x8xf32> -> vector<8x8xf32>
    %53 = arith.addf %47, %52 : vector<8x8xf32>
    %cst_44 = arith.constant dense<0.000000e+00> : vector<8x8xf32>
    %54 = tpu.matmul %19, %51, %cst_44 {dimension_numbers = #tpu.dot_dimension_numbers<[1], [0], [0], [1], [0, 0, 1, 1], [], []>} : vector<8x4xf32>, vector<4x8xf32>, vector<8x8xf32> -> vector<8x8xf32>
    %55 = arith.addf %49, %54 : vector<8x8xf32>
    %56 = vector.extract_strided_slice %1 {offsets = [1, 0, 1], sizes = [1, 4, 8], strides = [1, 1, 1]} : vector<2x4x9xf32> to vector<1x4x8xf32>
    %57 = vector.shape_cast %56 : vector<1x4x8xf32> to vector<4x8xf32>
    %cst_45 = arith.constant dense<0.000000e+00> : vector<8x8xf32>
    %58 = tpu.matmul %9, %57, %cst_45 {dimension_numbers = #tpu.dot_dimension_numbers<[1], [0], [0], [1], [0, 0, 1, 1], [], []>} : vector<8x4xf32>, vector<4x8xf32>, vector<8x8xf32> -> vector<8x8xf32>
    %59 = arith.addf %53, %58 : vector<8x8xf32>
    %cst_46 = arith.constant dense<0.000000e+00> : vector<8x8xf32>
    %60 = tpu.matmul %21, %57, %cst_46 {dimension_numbers = #tpu.dot_dimension_numbers<[1], [0], [0], [1], [0, 0, 1, 1], [], []>} : vector<8x4xf32>, vector<4x8xf32>, vector<8x8xf32> -> vector<8x8xf32>
    %61 = arith.addf %55, %60 : vector<8x8xf32>
    %c0_47 = arith.constant 0 : index
    %c0_48 = arith.constant 0 : index
    %62 = vector.load %arg5[%c0_47, %c0_48] : memref<8x1xf32, #tpu.memory_space<vmem>>, vector<8x1xf32>
    %c0_49 = arith.constant 0 : index
    %c0_50 = arith.constant 0 : index
    %63 = vector.load %arg6[%c0_49, %c0_50] : memref<8x1xf32, #tpu.memory_space<vmem>>, vector<8x1xf32>
    %cst_51 = arith.constant dense<0.000000e+00> : vector<8xf32>
    %64 = vector.multi_reduction <add>, %39, %cst_51 [1] : vector<8x8xf32> to vector<8xf32>
    %65 = vector.shape_cast %64 : vector<8xf32> to vector<8x1xf32>
    %cst_52 = arith.constant 0.000000e+00 : f32
    %66 = vector.broadcast %cst_52 : f32 to vector<8x1xf32>
    %67 = arith.addf %66, %65 : vector<8x1xf32>
    %cst_53 = arith.constant dense<0.000000e+00> : vector<8xf32>
    %68 = vector.multi_reduction <add>, %59, %cst_53 [1] : vector<8x8xf32> to vector<8xf32>
    %69 = vector.shape_cast %68 : vector<8xf32> to vector<8x1xf32>
    %70 = arith.addf %67, %69 : vector<8x1xf32>
    %71 = arith.mulf %39, %39 : vector<8x8xf32>
    %cst_54 = arith.constant dense<0.000000e+00> : vector<8xf32>
    %72 = vector.multi_reduction <add>, %71, %cst_54 [1] : vector<8x8xf32> to vector<8xf32>
    %73 = vector.shape_cast %72 : vector<8xf32> to vector<8x1xf32>
    %cst_55 = arith.constant 0.000000e+00 : f32
    %74 = vector.broadcast %cst_55 : f32 to vector<8x1xf32>
    %75 = arith.addf %74, %73 : vector<8x1xf32>
    %76 = arith.mulf %59, %59 : vector<8x8xf32>
    %cst_56 = arith.constant dense<0.000000e+00> : vector<8xf32>
    %77 = vector.multi_reduction <add>, %76, %cst_56 [1] : vector<8x8xf32> to vector<8xf32>
    %78 = vector.shape_cast %77 : vector<8xf32> to vector<8x1xf32>
    %79 = arith.addf %75, %78 : vector<8x1xf32>
    %cst_57 = arith.constant 1.600000e+01 : f32
    %80 = vector.broadcast %cst_57 : f32 to vector<8x1xf32>
    %81 = arith.divf %70, %80 : vector<8x1xf32>
    %cst_58 = arith.constant 1.600000e+01 : f32
    %82 = vector.broadcast %cst_58 : f32 to vector<8x1xf32>
    %83 = arith.divf %79, %82 : vector<8x1xf32>
    %84 = arith.mulf %81, %81 : vector<8x1xf32>
    %85 = arith.subf %83, %84 : vector<8x1xf32>
    %cst_59 = arith.constant 9.99999974E-6 : f32
    %86 = vector.broadcast %cst_59 : f32 to vector<8x1xf32>
    %87 = arith.addf %85, %86 : vector<8x1xf32>
    %88 = math.rsqrt %87 : vector<8x1xf32>
    %89 = arith.mulf %62, %88 : vector<8x1xf32>
    %90 = arith.mulf %81, %89 : vector<8x1xf32>
    %91 = arith.subf %63, %90 : vector<8x1xf32>
    %cst_60 = arith.constant 0.000000e+00 : f32
    %92 = vector.broadcast %cst_60 : f32 to vector<8x10xf32>
    %c0_61 = arith.constant 0 : index
    %c0_62 = arith.constant 0 : index
    %93 = vector.load %arg10[%c0_61, %c0_62] : memref<8x10xf32, #tpu.memory_space<vmem>>, vector<8x10xf32>
    tpu.vector_store %arg10[%c0_61, %c0_62], %92 {strides = array<i32>} : memref<8x10xf32, #tpu.memory_space<vmem>>, vector<8x10xf32>,
    %94 = vector.broadcast %89 : vector<8x1xf32> to vector<8x8xf32>
    %95 = arith.mulf %39, %94 : vector<8x8xf32>
    %96 = vector.broadcast %91 : vector<8x1xf32> to vector<8x8xf32>
    %97 = arith.addf %95, %96 : vector<8x8xf32>
    %cst_63 = arith.constant 0.000000e+00 : f32
    %98 = vector.broadcast %cst_63 : f32 to vector<8x8xf32>
    %99 = arith.maximumf %97, %98 : vector<8x8xf32>
    %c0_64 = arith.constant 0 : index
    %c1_65 = arith.constant 1 : index
    %100 = vector.load %arg10[%c0_64, %c1_65] : memref<8x10xf32, #tpu.memory_space<vmem>>, vector<8x8xf32>
    tpu.vector_store %arg10[%c0_64, %c1_65], %99 {strides = array<i32>} : memref<8x10xf32, #tpu.memory_space<vmem>>, vector<8x8xf32>,
    %cst_66 = arith.constant 0.000000e+00 : f32
    %101 = vector.broadcast %cst_66 : f32 to vector<8x10xf32>
    %c0_67 = arith.constant 0 : index
    %c0_68 = arith.constant 0 : index
    %102 = vector.load %arg11[%c0_67, %c0_68] : memref<8x10xf32, #tpu.memory_space<vmem>>, vector<8x10xf32>
    tpu.vector_store %arg11[%c0_67, %c0_68], %101 {strides = array<i32>} : memref<8x10xf32, #tpu.memory_space<vmem>>, vector<8x10xf32>,
    %103 = vector.broadcast %89 : vector<8x1xf32> to vector<8x8xf32>
    %104 = arith.mulf %59, %103 : vector<8x8xf32>
    %105 = vector.broadcast %91 : vector<8x1xf32> to vector<8x8xf32>
    %106 = arith.addf %104, %105 : vector<8x8xf32>
    %cst_69 = arith.constant 0.000000e+00 : f32
    %107 = vector.broadcast %cst_69 : f32 to vector<8x8xf32>
    %108 = arith.maximumf %106, %107 : vector<8x8xf32>
    %c0_70 = arith.constant 0 : index
    %c1_71 = arith.constant 1 : index
    %109 = vector.load %arg11[%c0_70, %c1_71] : memref<8x10xf32, #tpu.memory_space<vmem>>, vector<8x8xf32>
    tpu.vector_store %arg11[%c0_70, %c1_71], %108 {strides = array<i32>} : memref<8x10xf32, #tpu.memory_space<vmem>>, vector<8x8xf32>,
    %cst_72 = arith.constant 0.000000e+00 : f32
    %110 = vector.broadcast %cst_72 : f32 to vector<8x8xf32>
    %c0_73 = arith.constant 0 : index
    %c0_74 = arith.constant 0 : index
    %111 = vector.load %arg10[%c0_73, %c0_74] : memref<8x10xf32, #tpu.memory_space<vmem>>, vector<8x8xf32>
    %cst_75 = arith.constant dense<0.000000e+00> : vector<8x8xf32>
    %112 = tpu.matmul %11, %111, %cst_75 {dimension_numbers = #tpu.dot_dimension_numbers<[1], [0], [0], [1], [0, 0, 1, 1], [], []>} : vector<8x8xf32>, vector<8x8xf32>, vector<8x8xf32> -> vector<8x8xf32>
    %113 = arith.addf %110, %112 : vector<8x8xf32>
    %c0_76 = arith.constant 0 : index
    %c1_77 = arith.constant 1 : index
    %114 = vector.load %arg10[%c0_76, %c1_77] : memref<8x10xf32, #tpu.memory_space<vmem>>, vector<8x8xf32>
    %cst_78 = arith.constant dense<0.000000e+00> : vector<8x8xf32>
    %115 = tpu.matmul %13, %114, %cst_78 {dimension_numbers = #tpu.dot_dimension_numbers<[1], [0], [0], [1], [0, 0, 1, 1], [], []>} : vector<8x8xf32>, vector<8x8xf32>, vector<8x8xf32> -> vector<8x8xf32>
    %116 = arith.addf %113, %115 : vector<8x8xf32>
    %c0_79 = arith.constant 0 : index
    %c2_80 = arith.constant 2 : index
    %117 = vector.load %arg10[%c0_79, %c2_80] : memref<8x10xf32, #tpu.memory_space<vmem>>, vector<8x8xf32>
    %cst_81 = arith.constant dense<0.000000e+00> : vector<8x8xf32>
    %118 = tpu.matmul %15, %117, %cst_81 {dimension_numbers = #tpu.dot_dimension_numbers<[1], [0], [0], [1], [0, 0, 1, 1], [], []>} : vector<8x8xf32>, vector<8x8xf32>, vector<8x8xf32> -> vector<8x8xf32>
    %119 = arith.addf %116, %118 : vector<8x8xf32>
    %cst_82 = arith.constant 0.000000e+00 : f32
    %120 = vector.broadcast %cst_82 : f32 to vector<8x8xf32>
    %c0_83 = arith.constant 0 : index
    %c0_84 = arith.constant 0 : index
    %121 = vector.load %arg11[%c0_83, %c0_84] : memref<8x10xf32, #tpu.memory_space<vmem>>, vector<8x8xf32>
    %cst_85 = arith.constant dense<0.000000e+00> : vector<8x8xf32>
    %122 = tpu.matmul %11, %121, %cst_85 {dimension_numbers = #tpu.dot_dimension_numbers<[1], [0], [0], [1], [0, 0, 1, 1], [], []>} : vector<8x8xf32>, vector<8x8xf32>, vector<8x8xf32> -> vector<8x8xf32>
    %123 = arith.addf %120, %122 : vector<8x8xf32>
    %c0_86 = arith.constant 0 : index
    %c1_87 = arith.constant 1 : index
    %124 = vector.load %arg11[%c0_86, %c1_87] : memref<8x10xf32, #tpu.memory_space<vmem>>, vector<8x8xf32>
    %cst_88 = arith.constant dense<0.000000e+00> : vector<8x8xf32>
    %125 = tpu.matmul %13, %124, %cst_88 {dimension_numbers = #tpu.dot_dimension_numbers<[1], [0], [0], [1], [0, 0, 1, 1], [], []>} : vector<8x8xf32>, vector<8x8xf32>, vector<8x8xf32> -> vector<8x8xf32>
    %126 = arith.addf %123, %125 : vector<8x8xf32>
    %c0_89 = arith.constant 0 : index
    %c2_90 = arith.constant 2 : index
    %127 = vector.load %arg11[%c0_89, %c2_90] : memref<8x10xf32, #tpu.memory_space<vmem>>, vector<8x8xf32>
    %cst_91 = arith.constant dense<0.000000e+00> : vector<8x8xf32>
    %128 = tpu.matmul %15, %127, %cst_91 {dimension_numbers = #tpu.dot_dimension_numbers<[1], [0], [0], [1], [0, 0, 1, 1], [], []>} : vector<8x8xf32>, vector<8x8xf32>, vector<8x8xf32> -> vector<8x8xf32>
    %129 = arith.addf %126, %128 : vector<8x8xf32>
    %c0_92 = arith.constant 0 : index
    %c0_93 = arith.constant 0 : index
    %130 = vector.load %arg7[%c0_92, %c0_93] : memref<8x1xf32, #tpu.memory_space<vmem>>, vector<8x1xf32>
    %c0_94 = arith.constant 0 : index
    %c0_95 = arith.constant 0 : index
    %131 = vector.load %arg8[%c0_94, %c0_95] : memref<8x1xf32, #tpu.memory_space<vmem>>, vector<8x1xf32>
    %cst_96 = arith.constant dense<0.000000e+00> : vector<8xf32>
    %132 = vector.multi_reduction <add>, %119, %cst_96 [1] : vector<8x8xf32> to vector<8xf32>
    %133 = vector.shape_cast %132 : vector<8xf32> to vector<8x1xf32>
    %cst_97 = arith.constant 0.000000e+00 : f32
    %134 = vector.broadcast %cst_97 : f32 to vector<8x1xf32>
    %135 = arith.addf %134, %133 : vector<8x1xf32>
    %cst_98 = arith.constant dense<0.000000e+00> : vector<8xf32>
    %136 = vector.multi_reduction <add>, %129, %cst_98 [1] : vector<8x8xf32> to vector<8xf32>
    %137 = vector.shape_cast %136 : vector<8xf32> to vector<8x1xf32>
    %138 = arith.addf %135, %137 : vector<8x1xf32>
    %139 = arith.mulf %119, %119 : vector<8x8xf32>
    %cst_99 = arith.constant dense<0.000000e+00> : vector<8xf32>
    %140 = vector.multi_reduction <add>, %139, %cst_99 [1] : vector<8x8xf32> to vector<8xf32>
    %141 = vector.shape_cast %140 : vector<8xf32> to vector<8x1xf32>
    %cst_100 = arith.constant 0.000000e+00 : f32
    %142 = vector.broadcast %cst_100 : f32 to vector<8x1xf32>
    %143 = arith.addf %142, %141 : vector<8x1xf32>
    %144 = arith.mulf %129, %129 : vector<8x8xf32>
    %cst_101 = arith.constant dense<0.000000e+00> : vector<8xf32>
    %145 = vector.multi_reduction <add>, %144, %cst_101 [1] : vector<8x8xf32> to vector<8xf32>
    %146 = vector.shape_cast %145 : vector<8xf32> to vector<8x1xf32>
    %147 = arith.addf %143, %146 : vector<8x1xf32>
    %cst_102 = arith.constant 1.600000e+01 : f32
    %148 = vector.broadcast %cst_102 : f32 to vector<8x1xf32>
    %149 = arith.divf %138, %148 : vector<8x1xf32>
    %cst_103 = arith.constant 1.600000e+01 : f32
    %150 = vector.broadcast %cst_103 : f32 to vector<8x1xf32>
    %151 = arith.divf %147, %150 : vector<8x1xf32>
    %152 = arith.mulf %149, %149 : vector<8x1xf32>
    %153 = arith.subf %151, %152 : vector<8x1xf32>
    %cst_104 = arith.constant 9.99999974E-6 : f32
    %154 = vector.broadcast %cst_104 : f32 to vector<8x1xf32>
    %155 = arith.addf %153, %154 : vector<8x1xf32>
    %156 = math.rsqrt %155 : vector<8x1xf32>
    %157 = arith.mulf %130, %156 : vector<8x1xf32>
    %158 = arith.mulf %149, %157 : vector<8x1xf32>
    %159 = arith.subf %131, %158 : vector<8x1xf32>
    %160 = vector.broadcast %157 : vector<8x1xf32> to vector<8x8xf32>
    %161 = arith.mulf %119, %160 : vector<8x8xf32>
    %162 = vector.broadcast %159 : vector<8x1xf32> to vector<8x8xf32>
    %163 = arith.addf %161, %162 : vector<8x8xf32>
    %cst_105 = arith.constant 0.000000e+00 : f32
    %164 = vector.broadcast %cst_105 : f32 to vector<8x8xf32>
    %165 = arith.maximumf %163, %164 : vector<8x8xf32>
    %166 = arith.addf %165, %41 : vector<8x8xf32>
    %c0_106 = arith.constant 0 : index
    %c0_107 = arith.constant 0 : index
    %c0_108 = arith.constant 0 : index
    %167 = vector.load %arg9[%c0_106, %c0_107, %c0_108] : memref<2x8x8xf32, #tpu.memory_space<vmem>>, vector<1x8x8xf32>
    %168 = vector.shape_cast %167 : vector<1x8x8xf32> to vector<8x8xf32>
    %169 = vector.shape_cast %166 : vector<8x8xf32> to vector<1x8x8xf32>
    tpu.vector_store %arg9[%c0_106, %c0_107, %c0_108], %169 {strides = array<i32>} : memref<2x8x8xf32, #tpu.memory_space<vmem>>, vector<1x8x8xf32>,
    %170 = vector.broadcast %157 : vector<8x1xf32> to vector<8x8xf32>
    %171 = arith.mulf %129, %170 : vector<8x8xf32>
    %172 = vector.broadcast %159 : vector<8x1xf32> to vector<8x8xf32>
    %173 = arith.addf %171, %172 : vector<8x8xf32>
    %cst_109 = arith.constant 0.000000e+00 : f32
    %174 = vector.broadcast %cst_109 : f32 to vector<8x8xf32>
    %175 = arith.maximumf %173, %174 : vector<8x8xf32>
    %176 = arith.addf %175, %61 : vector<8x8xf32>
    %c1_110 = arith.constant 1 : index
    %c0_111 = arith.constant 0 : index
    %c0_112 = arith.constant 0 : index
    %177 = vector.load %arg9[%c1_110, %c0_111, %c0_112] : memref<2x8x8xf32, #tpu.memory_space<vmem>>, vector<1x8x8xf32>
    %178 = vector.shape_cast %177 : vector<1x8x8xf32> to vector<8x8xf32>
    %179 = vector.shape_cast %176 : vector<8x8xf32> to vector<1x8x8xf32>
    tpu.vector_store %arg9[%c1_110, %c0_111, %c0_112], %179 {strides = array<i32>} : memref<2x8x8xf32, #tpu.memory_space<vmem>>, vector<1x8x8xf32>,
    return
  }
  func.func @transform_0(%arg0: i32) -> (i32, i32, i32, i32) {
    %c0_i32 = arith.constant 0 : i32
    %c0_i32_0 = arith.constant 0 : i32
    %c0_i32_1 = arith.constant 0 : i32
    %c0_i32_2 = arith.constant 0 : i32
    %c0_i32_3 = arith.constant 0 : i32
    return %c0_i32, %c0_i32_0, %c0_i32_1, %c0_i32_2 : i32, i32, i32, i32
  }
  func.func @transform_1(%arg0: i32) -> (i32, i32, i32) {
    %c0_i32 = arith.constant 0 : i32
    %c0_i32_0 = arith.constant 0 : i32
    %c0_i32_1 = arith.constant 0 : i32
    %c0_i32_2 = arith.constant 0 : i32
    return %c0_i32, %c0_i32_0, %c0_i32_1 : i32, i32, i32
  }
  func.func @transform_2(%arg0: i32) -> (i32, i32, i32) {
    %c0_i32 = arith.constant 0 : i32
    %c0_i32_0 = arith.constant 0 : i32
    %c0_i32_1 = arith.constant 0 : i32
    %c0_i32_2 = arith.constant 0 : i32
    return %c0_i32, %c0_i32_0, %c0_i32_1 : i32, i32, i32
  }
  func.func @transform_3(%arg0: i32) -> (i32, i32, i32) {
    %c0_i32 = arith.constant 0 : i32
    %c0_i32_0 = arith.constant 0 : i32
    %c0_i32_1 = arith.constant 0 : i32
    %c0_i32_2 = arith.constant 0 : i32
    return %c0_i32, %c0_i32_0, %c0_i32_1 : i32, i32, i32
  }
  func.func @transform_4(%arg0: i32) -> (i32, i32) {
    %c0_i32 = arith.constant 0 : i32
    %c0_i32_0 = arith.constant 0 : i32
    %c0_i32_1 = arith.constant 0 : i32
    return %c0_i32, %c0_i32_0 : i32, i32
  }
  func.func @transform_5(%arg0: i32) -> (i32, i32) {
    %c0_i32 = arith.constant 0 : i32
    %c0_i32_0 = arith.constant 0 : i32
    %c0_i32_1 = arith.constant 0 : i32
    return %c0_i32, %c0_i32_0 : i32, i32
  }
  func.func @transform_6(%arg0: i32) -> (i32, i32) {
    %c0_i32 = arith.constant 0 : i32
    %c0_i32_0 = arith.constant 0 : i32
    %c0_i32_1 = arith.constant 0 : i32
    return %c0_i32, %c0_i32_0 : i32, i32
  }
  func.func @transform_7(%arg0: i32) -> (i32, i32) {
    %c0_i32 = arith.constant 0 : i32
    %c0_i32_0 = arith.constant 0 : i32
    %c0_i32_1 = arith.constant 0 : i32
    return %c0_i32, %c0_i32_0 : i32, i32
  }
  func.func @transform_8(%arg0: i32) -> (i32, i32, i32) {
    %c0_i32 = arith.constant 0 : i32
    %c0_i32_0 = arith.constant 0 : i32
    %c0_i32_1 = arith.constant 0 : i32
    %c0_i32_2 = arith.constant 0 : i32
    return %c0_i32, %c0_i32_0, %c0_i32_1 : i32, i32, i32
  }
}

</mosaic_0001>

<bundles_post_ra>
// kernel: tpu_custom_call.1
= control target key start
LH: loop header
LB: loop body
LE: loop exit
PB: predicated region body
PF: predicated region fallthrough
CT: control target
= control target key end

     0   :  { %s1709_s29 = smov 127   ;;  %v1710_v1 = vmov 0.0   ;;  %vm54_vm0 = vcmask 1043456   ;;  %vm50_vm1 = vcmask 31744   ;;  %vm1711_vm2 = vmmov 0   ;;  %s1923_s0 = inlined_call_operand.vmem [shape: f32[2,2,4,9], index: 0, kind: input, shape index: {}]   ;;  %s1924_s1 = inlined_call_operand.vmem [shape: f32[3,8,4], index: 1, kind: input, shape index: {}]   ;;  %s1925_s2 = inlined_call_operand.vmem [shape: f32[3,8,8], index: 2, kind: input, shape index: {}]   ;;  %s1926_s3 = inlined_call_operand.vmem [shape: f32[3,8,4], index: 3, kind: input, shape index: {}]   ;;  %s1927_s4 = inlined_call_operand.vmem [shape: f32[8,1], index: 4, kind: input, shape index: {}]   ;;  %s1928_s5 = inlined_call_operand.vmem [shape: f32[8,1], index: 5, kind: input, shape index: {}]   ;;  %s1929_s6 = inlined_call_operand.vmem [shape: f32[8,1], index: 6, kind: input, shape index: {}]   ;;  %s1930_s7 = inlined_call_operand.vmem [shape: f32[8,1], index: 7, kind: input, shape index: {}]   ;;  %s1931_s8 = inlined_call_operand.hbm [shape: f32[2,8,8], index: 8, kind: output, shape index: {}]  }
   0x1   :  { %v30_v0 = vld [vmem:[%s1923_s0] sm:$0xf]  ;;  %1582 = vmatprep.subr.mxu0 %v1710_v1  ;;  %v1508_v2 = vld [vmem:[%s1923_s0 + $0x8] sm:$0xf]  ;;  %v31_v4 = vld [vmem:[%s1923_s0 + $0x4] sm:$0xf]  ;;  %1584 = vmatprep.mubr.msk.f32.mxu0 %vm1711_vm2, %v1710_v1 }
   0x2   :  { %350 = vrot.lane.b32.xlu0 %v30_v0, %s1709_s29  ;;  %v1510_v3 = vld [vmem:[%s1924_s1 + $0x8] sm:$0xff]  ;;  %1583 = vmatpush3.msk.msra.mxu0 %vm54_vm0, %v1508_v2  ;;  %v35_v5 = vld [vmem:[%s1924_s1] sm:$0xff] }
   0x3   :  { %1585 = vmatmul.mubr.msk.f32.vlgmr.msra.gmra.mxu0 %vm50_vm1, %v1510_v3  ;;  %1587 = vmatprep.subr.mxu1 %v1710_v1 }
   0x4   :  { %1588 = vmatpush3.msk.msra.mxu1 %vm54_vm0, %v30_v0  ;;  %1589 = vmatprep.mubr.msk.f32.mxu1 %vm1711_vm2, %v1710_v1 }
   0x5   :  { %13 = vsyncpa [#allocation5], 0  ;;  %1590 = vmatmul.mubr.msk.f32.vlgmr.msra.gmra.mxu1 %vm50_vm1, %v35_v5  ;;  %v1514_v6 = vld [vmem:[%s1926_s3 + $0x8] sm:$0xff]  ;;  %1592 = vmatprep.subr.mxu0 %v1710_v1  ;;  %v45_v7 = vld [vmem:[%s1926_s3] sm:$0xff]  ;;  %vm936_vm3 = vcmask 64512   ;;  %v1712_v51 = vmov 0  }
   0x6   :  { %788 = vrot.lane.b32.xlu0 %v31_v4, %s1709_s29  ;;  %1594 = vmatprep.mubr.msk.f32.mxu0 %vm1711_vm2, %v1710_v1  ;;  %v1511_v8 = vld [vmem:[%s1924_s1 + $0x10] sm:$0xff]  ;;  %v1509_v11 = vld [vmem:[%s1923_s0 + $0xc] sm:$0xf]  ;;  %v934_v63 = vld [vmem:[%s1927_s4] sm:$0xff]  ;;  %vm965_vm4 = vcmask 80896   ;;  %s1713_s4 = smov 1  }
   0x7   :  { %1593 = vmatpush3.msk.msra.mxu0 %vm54_vm0, %v1508_v2  ;;  %1597 = vmatprep.subr.mxu1 %v1710_v1  ;;  %v1515_v9 = vld [vmem:[%s1926_s3 + $0x10] sm:$0xff]  ;;  %966 = vst.msk [vmem:[#allocation2] sm:$0xff] %vm965_vm4, %v1710_v1  ;;  %986 = vst.msk [vmem:[#allocation3] sm:$0xff] %vm965_vm4, %v1710_v1  ;;  %vm984_vm5 = vcmask 72712   ;;  %s1714_s28 = smov 126   ;;  %s1715_s14 = smov [#allocation4]  }
   0x8   :  { %1595 = vmatmul.mubr.msk.f32.vlgmr.msra.gmra.mxu0 %vm50_vm1, %v1514_v6  ;;  %1598 = vmatpush3.msk.msra.mxu1 %vm54_vm0, %v30_v0  ;;  %s1497_s15 = sshll.u32 %s1715_s14, 4  ;;  %s1498_s15 = int_to_ptr.vmem [resolvable:$true] %s1497_s15 }
   0x9   :  { %1599 = vmatprep.mubr.msk.f32.mxu1 %vm1711_vm2, %v1710_v1  ;;  %1602 = vmatprep.subr.mxu0 %v1710_v1  ;;  %p1692_p1 = scmp.lt.s32.totalorder %s1498_s15, %s1498_s15 }
   0xa   :  { %1600 = vmatmul.mubr.msk.f32.vlgmr.msra.gmra.mxu1 %vm50_vm1, %v45_v7  ;;  %1607 = vmatprep.subr.mxu1 %v1710_v1 }
   0xb   :  { %1604 = vmatprep.mubr.msk.f32.mxu0 %vm1711_vm2, %v1710_v1  ;;  %1609 = vmatprep.mubr.msk.f32.mxu1 %vm1711_vm2, %v1710_v1 }
   0xc   :  { %1681 = vset.pattern.permute.xlu1 %v1712_v51  ;;  %1682 = vset.pattern.permute.xlu0 %v1712_v51 }
  0x74   :  { %v351_v10 = vpop.permute.xlu0 %350 }
  0x75   :  { %1603 = vmatpush3.msk.msra.mxu0 %vm54_vm0, %v351_v10  ;;  %1608 = vmatpush3.msk.msra.mxu1 %vm54_vm0, %v351_v10 }
  0x76   :  { %1605 = vmatmul.mubr.msk.f32.vlgmr.msra.gmra.mxu0 %vm50_vm1, %v1511_v8  ;;  %1610 = vmatmul.mubr.msk.f32.vlgmr.msra.gmra.mxu1 %vm50_vm1, %v1515_v9 }
  0x77   :  { %1612 = vmatprep.subr.mxu0 %v1710_v1  ;;  %1617 = vmatprep.subr.mxu1 %v1710_v1 }
  0x78   :  { %1613 = vmatpush3.msk.msra.mxu0 %vm54_vm0, %v1509_v11  ;;  %1614 = vmatprep.mubr.msk.f32.mxu0 %vm1711_vm2, %v1710_v1  ;;  %v789_v12 = vpop.permute.xlu0 %788 }
  0x79   :  { %1618 = vmatpush3.msk.msra.mxu1 %vm54_vm0, %v31_v4  ;;  %1619 = vmatprep.mubr.msk.f32.mxu1 %vm1711_vm2, %v1710_v1 }
  0x7a   :  { %1615 = vmatmul.mubr.msk.f32.vlgmr.msra.gmra.mxu0 %vm50_vm1, %v1510_v3  ;;  %1620 = vmatmul.mubr.msk.f32.vlgmr.msra.gmra.mxu1 %vm50_vm1, %v35_v5  ;;  %v935_v3 = vld [vmem:[%s1928_s5] sm:$0xff] }
  0x7b   :  { %1622 = vmatprep.subr.mxu0 %v1710_v1  ;;  %1627 = vmatprep.subr.mxu1 %v1710_v1 }
  0x7c   :  { %1623 = vmatpush3.msk.msra.mxu0 %vm54_vm0, %v1509_v11  ;;  %1624 = vmatprep.mubr.msk.f32.mxu0 %vm1711_vm2, %v1710_v1 }
  0x7d   :  { %1628 = vmatpush3.msk.msra.mxu1 %vm54_vm0, %v31_v4  ;;  %1629 = vmatprep.mubr.msk.f32.mxu1 %vm1711_vm2, %v1710_v1 }
  0x7e   :  { %1625 = vmatmul.mubr.msk.f32.vlgmr.msra.gmra.mxu0 %vm50_vm1, %v1514_v6  ;;  %1630 = vmatmul.mubr.msk.f32.vlgmr.msra.gmra.mxu1 %vm50_vm1, %v45_v7 }
  0x7f   :  { %1632 = vmatprep.subr.mxu0 %v1710_v1  ;;  %1637 = vmatprep.subr.mxu1 %v1710_v1 }
  0x80   :  { %1633 = vmatpush3.msk.msra.mxu0 %vm54_vm0, %v789_v12  ;;  %1634 = vmatprep.mubr.msk.f32.mxu0 %vm1711_vm2, %v1710_v1 }
  0x81   :  { %1638 = vmatpush3.msk.msra.mxu1 %vm54_vm0, %v789_v12  ;;  %1639 = vmatprep.mubr.msk.f32.mxu1 %vm1711_vm2, %v1710_v1 }
  0x82   :  { %1635 = vmatmul.mubr.msk.f32.vlgmr.msra.gmra.mxu0 %vm50_vm1, %v1511_v8  ;;  %1640 = vmatmul.mubr.msk.f32.vlgmr.msra.gmra.mxu1 %vm50_vm1, %v1515_v9 }
  0x83   :  { %1647 = vmatprep.subr.mxu1 %v1710_v1  ;;  %1642 = vmatprep.subr.mxu0 %v1710_v1 }
  0x84   :  { %1644 = vmatprep.mubr.msk.f32.mxu0 %vm1711_vm2, %v1710_v1  ;;  %1649 = vmatprep.mubr.msk.f32.mxu1 %vm1711_vm2, %v1710_v1 }
  0xc3   :  { %v124_v13 = vpop.f32.mrf.mxu0 }
  0xc5   :  { %v1586_v14 = vpop.f32.mrf.mxu0  ;;  %v200_v15 = vpop.f32.mrf.mxu1 }
  0xc6   :  { %v201_v16 = vadd.f32 %v200_v15, %v124_v13 }
  0xc7   :  { %v1591_v17 = vpop.f32.mrf.mxu1 }
  0xc8   :  { %v273_v18 = vpop.f32.mrf.mxu0 }
  0xca   :  { %v1596_v19 = vpop.f32.mrf.mxu0  ;;  %v346_v20 = vpop.f32.mrf.mxu1 }
  0xcb   :  { %v347_v21 = vadd.f32 %v346_v20, %v273_v18  ;;  %v1512_v19 = vld [vmem:[%s1925_s2 + $0x8] sm:$0xff] }
  0xcc   :  { %v1601_v22 = vpop.f32.mrf.mxu1 }
  0xcd   :  { %v1513_v22 = vld [vmem:[%s1925_s2 + $0x10] sm:$0xff] }
 0x136   :  { %v423_v23 = vpop.f32.mrf.mxu0  ;;  %v497_v24 = vpop.f32.mrf.mxu1 }
 0x137   :  { %v427_v25 = vadd.f32 %v423_v23, %v201_v16  ;;  %v1861_v26 = vadd.f32 %v497_v24, %v347_v21  ;;  %v40_v16 = vld [vmem:[%s1925_s2] sm:$0xff] }
 0x138   :  { %v1606_v27 = vpop.f32.mrf.mxu0  ;;  %v1611_v28 = vpop.f32.mrf.mxu1 }
 0x139   :  { %v937_v29 = vsel %vm936_vm3, %v427_v25, 0.0  ;;  %v945_v30 = vmul.f32 %v427_v25, %v427_v25 }
 0x13a   :  { %v571_v31 = vpop.f32.mrf.mxu0  ;;  %938 = vadd.xlane.f32.xlu1 %v937_v29  ;;  %v644_v32 = vpop.f32.mrf.mxu1 }
 0x13b   :  { %v946_v33 = vsel %vm936_vm3, %v945_v30, 0.0  ;;  %v645_v41 = vadd.f32 %v644_v32, %v571_v31 }
 0x13c   :  { %v1616_v34 = vpop.f32.mrf.mxu0  ;;  %947 = vadd.xlane.f32.xlu0 %v946_v33  ;;  %v1621_v35 = vpop.f32.mrf.mxu1 }
 0x13e   :  { %v714_v36 = vpop.f32.mrf.mxu0  ;;  %v784_v37 = vpop.f32.mrf.mxu1 }
 0x13f   :  { %v785_v38 = vadd.f32 %v784_v37, %v714_v36 }
 0x140   :  { %v1626_v39 = vpop.f32.mrf.mxu0  ;;  %v1631_v40 = vpop.f32.mrf.mxu1 }
 0x142   :  { %v858_v42 = vpop.f32.mrf.mxu0  ;;  %v929_v43 = vpop.f32.mrf.mxu1 }
 0x143   :  { %v862_v44 = vadd.f32 %v858_v42, %v645_v41  ;;  %v1865_v45 = vadd.f32 %v929_v43, %v785_v38 }
 0x144   :  { %v1636_v46 = vpop.f32.mrf.mxu0  ;;  %v1641_v47 = vpop.f32.mrf.mxu1 }
 0x145   :  { %v941_v48 = vsel %vm936_vm3, %v862_v44, 0.0  ;;  %v950_v49 = vmul.f32 %v862_v44, %v862_v44 }
 0x146   :  { %942 = vadd.xlane.f32.xlu1 %v941_v48 }
 0x147   :  { %v951_v50 = vsel %vm936_vm3, %v950_v49, 0.0 }
 0x14a   :  { %952 = vadd.xlane.f32.xlu1 %v951_v50 }
 0x1c3   :  { %v939_v52 = vpop.xlane.xlu1 %938 }
 0x1c5   :  { %v948_v56 = vpop.xlane.xlu0 %947 }
 0x1cf   :  { %v943_v53 = vpop.xlane.xlu1 %942 }
 0x1d0   :  { %v944_v54 = vadd.f32 %v943_v53, %v939_v52 }
 0x1d2   :  { %v956_v55 = vmul.f32 0.0625, %v944_v54 }
 0x1d3   :  { %v953_v57 = vpop.xlane.xlu1 %952 }
 0x1d4   :  { %v954_v58 = vadd.f32 %v953_v57, %v948_v56  ;;  %v958_v59 = vmul.f32 %v956_v55, %v956_v55 }
 0x1d6   :  { %v957_v60 = vmul.f32 0.0625, %v954_v58 }
 0x1d8   :  { %v959_v61 = vsub.f32 %v957_v60, %v958_v59  ;;  %v1442_v59 = vld [vmem:[%s1929_s6] sm:$0xff]  ;;  %s1687_s6 = scalar_lea.vmem %s1498_s15, 256 }
 0x1d9   :  { %p1688_p0 = scmp.ne.s32.totalorder %s1498_s15, %s1687_s6  ;;  %p1693_p2 = scmp.lt.s32.totalorder %s1687_s6, %s1687_s6 }
 0x1da   :  { %v960_v62 = vadd.f32 1e-05, %v959_v61 }
 0x1db   :  { %p1694_p3 = por %p1693_p2, %p1692_p1 }
 0x1dc   :  { %1683 = vrsqrt.f32 %v960_v62  ;;  %v1443_v62 = vld [vmem:[%s1930_s7] sm:$0xff] }
 0x1dd   :  { %p1695_p4 = pnand %p1694_p3, %p1688_p0 }
 0x1e9   :  { %v1684_v0 = vpop.eup %1683 }
 0x1ea   :  { %v962_v2 = vmul.f32 %v1684_v0, %v934_v63 }
 0x1ec   :  { %969 = vperm.xlu1 %1681, %v962_v2   ;;  %v963_v4 = vmul.f32 %v962_v2, %v956_v55 }
 0x1ee   :  { %v964_v5 = vsub.f32 %v935_v3, %v963_v4 }
 0x1f0   :  { %975 = vperm.xlu1 %1681, %v964_v5  }
 0x267   :  { %v970_v6 = vpop.permute.xlu1 %969 }
 0x268   :  { %v972_v7 = vmul.f32 %v970_v6, %v427_v25  ;;  %v987_v9 = vmul.f32 %v970_v6, %v862_v44 }
 0x26b   :  { %v976_v8 = vpop.permute.xlu1 %975 }
 0x26c   :  { %v978_v10 = vadd.f32 %v976_v8, %v972_v7  ;;  %v988_v12 = vadd.f32 %v987_v9, %v976_v8 }
 0x26e   :  { %v979_v11 = vmax.f32 %v978_v10, 0.0  ;;  %v989_v13 = vmax.f32 %v988_v12, 0.0 }
 0x270   :  { %981 = vrot.lane.b32.xlu1 %v979_v11, %s1713_s4 }
 0x274   :  { %991 = vrot.lane.b32.xlu1 %v989_v13, %s1713_s4 }
 0x2e2   :  { %v982_v14 = vpop.permute.xlu1 %981 }
 0x2e3   :  { %985 = vst.msk [vmem:[#allocation2] sm:$0xff] %vm984_vm5, %v982_v14 }
 0x2e6   :  { %v992_v15 = vpop.permute.xlu1 %991 }
 0x2e7   :  { %994 = vst.msk [vmem:[#allocation3] sm:$0xff] %vm984_vm5, %v992_v15 }
 0x2ea   :  { %v995_v17 = vld [vmem:[#allocation2] sm:$0xff] }
 0x2eb   :  { %997 = vrot.lane.b32.xlu0 %v995_v17, %s1709_s29  ;;  %1648 = vmatpush3.msra.mxu1 %v995_v17 }
 0x2ec   :  { %1146 = vrot.lane.b32.xlu1 %v995_v17, %s1714_s28  ;;  %1650 = vmatmul.mubr.msk.f32.vlgmr.msra.gmra.mxu1 %vm936_vm3, %v40_v16 }
 0x2ed   :  { %1657 = vmatprep.subr.mxu1 %v1710_v1  ;;  %1659 = vmatprep.mubr.msk.f32.mxu1 %vm1711_vm2, %v1710_v1 }
 0x2ee   :  { %v1223_v18 = vld [vmem:[#allocation3] sm:$0xff] }
 0x2f0   :  { %1225 = vrot.lane.b32.xlu1 %v1223_v18, %s1709_s29 }
 0x2f4   :  { %1368 = vrot.lane.b32.xlu1 %v1223_v18, %s1714_s28 }
 0x35d   :  { %v998_v20 = vpop.permute.xlu0 %997 }
 0x35e   :  { %v1147_v21 = vpop.permute.xlu1 %1146  ;;  %1643 = vmatpush3.msra.mxu0 %v998_v20 }
 0x35f   :  { %1645 = vmatmul.mubr.msk.f32.vlgmr.msra.gmra.mxu0 %vm936_vm3, %v1512_v19  ;;  %1652 = vmatprep.subr.mxu0 %v1710_v1 }
 0x360   :  { %1653 = vmatpush3.msra.mxu0 %v1147_v21  ;;  %1654 = vmatprep.mubr.msk.f32.mxu0 %vm1711_vm2, %v1710_v1 }
 0x361   :  { %1662 = vmatprep.subr.mxu0 %v1710_v1 }
 0x362   :  { %v1226_v23 = vpop.permute.xlu1 %1225 }
 0x363   :  { %1658 = vmatpush3.msra.mxu1 %v1226_v23  ;;  %1655 = vmatmul.mubr.msk.f32.vlgmr.msra.gmra.mxu0 %vm936_vm3, %v1513_v22 }
 0x364   :  { %1663 = vmatpush3.msra.mxu0 %v1223_v18  ;;  %1660 = vmatmul.mubr.msk.f32.vlgmr.msra.gmra.mxu1 %vm936_vm3, %v1512_v19 }
 0x365   :  { %1667 = vmatprep.subr.mxu1 %v1710_v1  ;;  %1664 = vmatprep.mubr.msk.f32.mxu0 %vm1711_vm2, %v1710_v1 }
 0x366   :  { %v1369_v24 = vpop.permute.xlu1 %1368  ;;  %1669 = vmatprep.mubr.msk.f32.mxu1 %vm1711_vm2, %v1710_v1 }
 0x367   :  { %1668 = vmatpush3.msra.mxu1 %v1369_v24  ;;  %1665 = vmatmul.mubr.msk.f32.vlgmr.msra.gmra.mxu0 %vm936_vm3, %v40_v16 }
 0x368   :  { %1670 = vmatmul.mubr.msk.f32.vlgmr.msra.gmra.mxu1 %vm936_vm3, %v1513_v22 }
 0x3ac   :  { %v1142_v25 = vpop.f32.mrf.mxu1 }
 0x3ae   :  { %v1651_v27 = vpop.f32.mrf.mxu1 }
 0x41f   :  { %v1069_v28 = vpop.f32.mrf.mxu0 }
 0x420   :  { %v1143_v30 = vadd.f32 %v1142_v25, %v1069_v28 }
 0x421   :  { %v1646_v29 = vpop.f32.mrf.mxu0 }
 0x423   :  { %v1218_v31 = vpop.f32.mrf.mxu0 }
 0x424   :  { %v1222_v32 = vadd.f32 %v1218_v31, %v1143_v30  ;;  %v1294_v33 = vpop.f32.mrf.mxu1 }
 0x425   :  { %v1656_v34 = vpop.f32.mrf.mxu0 }
 0x426   :  { %v1444_v35 = vsel %vm936_vm3, %v1222_v32, 0.0  ;;  %v1661_v36 = vpop.f32.mrf.mxu1  ;;  %v1452_v37 = vmul.f32 %v1222_v32, %v1222_v32 }
 0x427   :  { %v1364_v38 = vpop.f32.mrf.mxu0  ;;  %1445 = vadd.xlane.f32.xlu1 %v1444_v35 }
 0x428   :  { %v1365_v1 = vadd.f32 %v1364_v38, %v1294_v33  ;;  %v1437_v39 = vpop.f32.mrf.mxu1  ;;  %v1453_v42 = vsel %vm936_vm3, %v1452_v37, 0.0 }
 0x429   :  { %v1666_v40 = vpop.f32.mrf.mxu0 }
 0x42a   :  { %v1441_v41 = vadd.f32 %v1437_v39, %v1365_v1  ;;  %v1671_v43 = vpop.f32.mrf.mxu1 }
 0x42b   :  { %1454 = vadd.xlane.f32.xlu1 %v1453_v42 }
 0x42c   :  { %v1448_v44 = vsel %vm936_vm3, %v1441_v41, 0.0  ;;  %v1457_v46 = vmul.f32 %v1441_v41, %v1441_v41 }
 0x42d   :  { %1449 = vadd.xlane.f32.xlu0 %v1448_v44 }
 0x42e   :  { %v1458_v47 = vsel %vm936_vm3, %v1457_v46, 0.0 }
 0x431   :  { %1459 = vadd.xlane.f32.xlu0 %v1458_v47 }
 0x4b0   :  { %v1446_v48 = vpop.xlane.xlu1 %1445 }
 0x4b4   :  { %v1455_v52 = vpop.xlane.xlu1 %1454 }
 0x4b6   :  { %v1450_v49 = vpop.xlane.xlu0 %1449 }
 0x4b7   :  { %v1451_v50 = vadd.f32 %v1450_v49, %v1446_v48 }
 0x4b9   :  { %v1462_v51 = vmul.f32 0.0625, %v1451_v50 }
 0x4ba   :  { %v1460_v53 = vpop.xlane.xlu0 %1459 }
 0x4bb   :  { %v1461_v54 = vadd.f32 %v1460_v53, %v1455_v52  ;;  %v1464_v55 = vmul.f32 %v1462_v51, %v1462_v51 }
 0x4bd   :  { %v1463_v56 = vmul.f32 0.0625, %v1461_v54 }
 0x4bf   :  { %v1465_v57 = vsub.f32 %v1463_v56, %v1464_v55 }
 0x4c1   :  { %v1466_v58 = vadd.f32 1e-05, %v1465_v57 }
 0x4c3   :  { %1685 = vrsqrt.f32 %v1466_v58 }
 0x4d0   :  { %v1686_v60 = vpop.eup %1685 }
 0x4d1   :  { %v1468_v61 = vmul.f32 %v1686_v60, %v1442_v59 }
 0x4d3   :  { %1473 = vperm.xlu1 %1681, %v1468_v61   ;;  %v1469_v63 = vmul.f32 %v1468_v61, %v1462_v51 }
 0x4d5   :  { %v1470_v0 = vsub.f32 %v1443_v62, %v1469_v63 }
 0x4d7   :  { %1479 = vperm.xlu0 %1682, %v1470_v0  }
 0x54e   :  { %v1474_v2 = vpop.permute.xlu1 %1473 }
 0x54f   :  { %v1476_v3 = vmul.f32 %v1474_v2, %v1222_v32  ;;  %v1486_v4 = vmul.f32 %v1474_v2, %v1441_v41 }
 0x552   :  { %v1480_v5 = vpop.permute.xlu0 %1479 }
 0x553   :  { %v1482_v6 = vadd.f32 %v1480_v5, %v1476_v3  ;;  %v1487_v7 = vadd.f32 %v1486_v4, %v1480_v5 }
 0x555   :  { %v1483_v8 = vmax.f32 %v1482_v6, 0.0  ;;  %v1488_v9 = vmax.f32 %v1487_v7, 0.0 }
 0x557   :  { %v1484_v10 = vadd.f32 %v1483_v8, %v1861_v26  ;;  %v1489_v11 = vadd.f32 %v1488_v9, %v1865_v45 }
 0x559   :  { %1485 = vst.msk [vmem:[#allocation4] sm:$0xff] %vm936_vm3, %v1484_v10  ;;  %1491 = vst.msk [vmem:[#allocation4 + $0x8] sm:$0xff] %vm936_vm3, %v1489_v11 }
 0x55a   :  { %1698 = shalt.err (!%p1695_p4)
}
 0x55b   :  { %s1716_s7 = smov 128   ;;  %s1717_s16 = smov 8  }
 0x55c   :  { %1503 = dma.vmem_to_hbm [thread:$0]  %s1498_s15, 256, %s1931_s8, [#allocation5], %s1716_s7, %s1716_s7, %s1717_s16  }
 0x55d   :  { %1707 = dma.done.wait [#allocation5], 256  }
 0x55e   :  { %1708 = vsyncadd [#allocation5], 4294967040 }
 0x55f   :  { %1507 = vsyncpa [#allocation5], 1 }

</bundles_post_ra>
